<compile_context>
chip_gen: v7x
topology: tpu7x:2x2x1
jax: 0.10.0
libtpu: 0.0.40
codegen_flags: <defaults>
</compile_context>

<pallas_src>
import jax
import jax.numpy as jnp
import numpy as np
from jax.experimental import pallas as pl
from jax.experimental.pallas import tpu as pltpu


_VMEM_LIMIT = 48 * 1024 * 1024      # scoped-VMEM limit requested from Mosaic
_ROW_BUDGET = 28 * 1024 * 1024      # target bytes for per-step blocks + temps
_TARGET_STEPS = 8                   # >= 4 steps per TensorCore on v7x + pipeline depth


def _cdiv(a, b):
    return -(-a // b)


def _round_up(x, m):
    return _cdiv(x, m) * m


def _row_tile(H, per_row_bytes, n_outer, *, budget, sublane=1):
    """Input image rows per grid step.

    Largest tile that fits `budget` (double-buffered blocks + temps), balanced
    so all H tiles are roughly equal (no tiny ragged tail), while keeping at
    least _TARGET_STEPS total grid steps for megacore sharding and DMA
    pipelining.  `sublane > 1` enforces the block sublane-dim constraint when
    the row dim is second-to-last in the block.
    """
    cap = max(1, budget // max(per_row_bytes, 1))
    min_h_tiles = max(1, _cdiv(_TARGET_STEPS, max(n_outer, 1)))
    th = min(H, cap, _cdiv(H, min_h_tiles))
    if th >= H:
        return H
    th = _cdiv(H, _cdiv(H, th))                 # balance the tiles
    if sublane > 1:
        th = min(_round_up(th, sublane), H)     # multiple of 8 (or full dim)
    return th


# ---------------------------------------------------------------------------
# NCHW-native kernel (primary, PyTorch-compatible).
# ---------------------------------------------------------------------------

def _upsample2_nchw_kernel(x_ref, p_ref, o_ref):
    # x_ref: (1, TH, W)   input rows, W on the 128-lane axis
    # p_ref: (W, 2W)      one-hot interleave matrix, P[w, 2w] = P[w, 2w+1] = 1
    # o_ref: (1, TH, 4W)  o[0, t, dh*2W + 2w + dw] == x[0, t, w]
    two_w = p_ref.shape[1]
    x = x_ref[0]                                              # (TH, W)
    # dw duplication: lane interleave as a one-hot MXU matmul (MXU is idle in
    # this mem-bound kernel, so this is free and avoids a lane relayout).
    xx = jnp.dot(x, p_ref[...],
                 preferred_element_type=jnp.float32).astype(o_ref.dtype)
    # dh duplication: rows 2t and 2t+1 of the final image are adjacent in
    # memory, i.e. one 4W-wide output row -> two dense full-width stores.
    o_ref[0, :, :two_w] = xx
    o_ref[0, :, two_w:] = xx


@jax.jit
def upsample2_nearest(x_nchw):
    """PyTorch-compatible Upsample2 forward: NCHW in / NCHW out (mode='nearest')."""
    N, C, H, W = x_nchw.shape
    dtype = x_nchw.dtype
    itemsize = dtype.itemsize
    B = N * C

    # Constant one-hot column-interleave matrix (exact 0/1 entries).
    p = jnp.repeat(jnp.eye(W, dtype=dtype), 2, axis=1)        # (W, 2W)

    in_row = _round_up(W, 128) * itemsize                     # x block, per row
    mid_row = _round_up(2 * W, 128) * itemsize                # matmul temp, per row
    out_row = _round_up(4 * W, 128) * itemsize                # output block, per row
    p_bytes = 2 * _round_up(W, 8) * _round_up(2 * W, 128) * itemsize
    per_row = 2 * (in_row + out_row) + in_row + mid_row       # double-buffered + temps
    budget = max(4 * 1024 * 1024, _ROW_BUDGET - p_bytes)
    th = _row_tile(H, per_row, B, budget=budget, sublane=8)
    n_h = _cdiv(H, th)

    x3 = x_nchw.reshape(B, H, W)                              # metadata-only view

    out_wide = pl.pallas_call(
        _upsample2_nchw_kernel,
        out_shape=jax.ShapeDtypeStruct((B, H, 4 * W), dtype),
        grid=(B, n_h),
        in_specs=[
            pl.BlockSpec((1, th, W), lambda b, h: (b, h, 0)),
            pl.BlockSpec((W, 2 * W), lambda b, h: (0, 0)),    # constant block: fetched once
        ],
        out_specs=pl.BlockSpec((1, th, 4 * W), lambda b, h: (b, h, 0)),
        compiler_params=pltpu.CompilerParams(
            dimension_semantics=("parallel", "parallel"),
            vmem_limit_bytes=_VMEM_LIMIT,
        ),
        cost_estimate=pl.CostEstimate(
            flops=4 * B * H * W * W,                          # one-hot interleave matmul
            transcendentals=0,
            bytes_accessed=(5 * B * H * W + 2 * W * W) * itemsize,
        ),
    )(x3, p)

    # (B, H, 4W) is already the row-major interleaved (N, C, 2H, 2W): this
    # reshape is metadata-only (no HBM pass).
    return out_wide.reshape(N, C, 2 * H, 2 * W)


# ---------------------------------------------------------------------------
# NHWC (channels-last) kernel — for callers that keep activations in NHWC.
# ---------------------------------------------------------------------------

def _upsample2_nhwc_kernel(x_ref, o_ref):
    # x_ref: (1, TH, W, C); o_ref: (1, TH, 2, W, 2C)
    c = x_ref.shape[-1]
    x = x_ref[0]                                              # (TH, W, C)
    # Four direct stores (no concatenate -> no hidden output-sized VMEM temp).
    o_ref[0, :, 0, :, :c] = x
    o_ref[0, :, 0, :, c:] = x
    o_ref[0, :, 1, :, :c] = x
    o_ref[0, :, 1, :, c:] = x


@jax.jit
def upsample2_nearest_nhwc(x_nhwc):
    """Channels-last 2x nearest-neighbor upsample (NHWC in / NHWC out).

    Prefer this entry when activations already live in NHWC.  For small C
    (< 64) the 2C output lane dim is padded/masked; such shapes are better
    served by the NCHW-native `upsample2_nearest`.
    """
    N, H, W, C = x_nhwc.shape
    dtype = x_nhwc.dtype
    itemsize = dtype.itemsize

    in_row = _round_up(W, 8) * _round_up(C, 128) * itemsize
    out_row = 2 * _round_up(W, 8) * _round_up(2 * C, 128) * itemsize
    per_row = 2 * (in_row + out_row) + in_row                 # double-buffered + temp
    th = _row_tile(H, per_row, N, budget=_ROW_BUDGET)
    n_h = _cdiv(H, th)

    out5 = pl.pallas_call(
        _upsample2_nhwc_kernel,
        out_shape=jax.ShapeDtypeStruct((N, H, 2, W, 2 * C), dtype),
        grid=(N, n_h),
        in_specs=[pl.BlockSpec((1, th, W, C), lambda n, h: (n, h, 0, 0))],
        out_specs=pl.BlockSpec((1, th, 2, W, 2 * C), lambda n, h: (n, h, 0, 0, 0)),
        compiler_params=pltpu.CompilerParams(
            dimension_semantics=("parallel", "parallel"),
            vmem_limit_bytes=_VMEM_LIMIT,
        ),
        cost_estimate=pl.CostEstimate(
            flops=0, transcendentals=0,
            bytes_accessed=5 * N * H * W * C * itemsize,
        ),
    )(x_nhwc)

    # (N, H, 2, W, 2C) is the row-major interleaved (N, 2H, 2W, C).
    return out5.reshape(N, 2 * H, 2 * W, C)


def upsample2(x_nchw, mode="nearest"):
    """Functional equivalent of the PyTorch Upsample2 module."""
    if mode != "nearest":
        # TODO(synk): other interpolate modes (e.g. 'bilinear') not implemented.
        raise NotImplementedError(f"Unsupported mode: {mode}")
    return upsample2_nearest(x_nchw)


if __name__ == "__main__":
    key = jax.random.PRNGKey(0)
    N, C, H, W = 2, 4, 16, 16
    x = jax.random.normal(key, (N, C, H, W), dtype=jnp.float32)
    # Snap values to the bf16 grid so the one-hot MXU interleave is bit-exact
    # regardless of the platform's default f32 matmul precision mode.
    x = x.astype(jnp.bfloat16).astype(jnp.float32)

    # Pure-JAX reference of F.interpolate(x, scale_factor=2, mode='nearest').
    y_ref = jnp.repeat(jnp.repeat(x, 2, axis=2), 2, axis=3)

    # NCHW-native kernel (PyTorch-compatible entry point).
    y = jax.block_until_ready(upsample2(x))
    assert y.shape == (N, C, 2 * H, 2 * W), y.shape
    np.testing.assert_array_equal(np.asarray(y), np.asarray(y_ref))

    # Channels-last kernel (for NHWC callers).
    y_nhwc = jax.block_until_ready(
        upsample2_nearest_nhwc(jnp.transpose(x, (0, 2, 3, 1))))
    np.testing.assert_array_equal(
        np.asarray(y_nhwc), np.asarray(jnp.transpose(y_ref, (0, 2, 3, 1))))

    print("KERNEL_OK")
</pallas_src>

<mosaic_0001>
module attributes {stable_mosaic.version = 11 : i64} {
  func.func @_upsample2_nchw_kernel(%arg0: i32, %arg1: i32, %arg2: memref<1x16x16xf32, #tpu.memory_space<vmem>>, %arg3: memref<16x32xf32, #tpu.memory_space<vmem>>, %arg4: memref<1x16x64xf32, #tpu.memory_space<vmem>>) attributes {dimension_semantics = [#tpu.dimension_semantics<parallel>, #tpu.dimension_semantics<parallel>], iteration_bounds = array<i64: 8, 1>, scalar_prefetch = 0 : i64, scratch_operands = 0 : i64, tpu.core_type = #tpu.core_type<tc>, window_params = [{transform_indices = @transform_0, window_bounds = array<i64: 1, 16, 16>}, {pipeline_mode = #tpu.pipeline_mode<synchronous>, transform_indices = @transform_1, window_bounds = array<i64: 16, 32>}, {transform_indices = @transform_2, window_bounds = array<i64: 1, 16, 64>}]} {
    %c0 = arith.constant 0 : index
    %c0_0 = arith.constant 0 : index
    %c0_1 = arith.constant 0 : index
    %0 = vector.load %arg2[%c0, %c0_0, %c0_1] : memref<1x16x16xf32, #tpu.memory_space<vmem>>, vector<1x16x16xf32>
    %1 = vector.shape_cast %0 : vector<1x16x16xf32> to vector<16x16xf32>
    %c0_2 = arith.constant 0 : index
    %c0_3 = arith.constant 0 : index
    %2 = vector.load %arg3[%c0_2, %c0_3] : memref<16x32xf32, #tpu.memory_space<vmem>>, vector<16x32xf32>
    %cst = arith.constant dense<0.000000e+00> : vector<16x32xf32>
    %3 = tpu.matmul %1, %2, %cst {dimension_numbers = #tpu.dot_dimension_numbers<[1], [0], [0], [1], [0, 0, 1, 1], [], []>} : vector<16x16xf32>, vector<16x32xf32>, vector<16x32xf32> -> vector<16x32xf32>
    %c0_4 = arith.constant 0 : index
    %c0_5 = arith.constant 0 : index
    %c0_6 = arith.constant 0 : index
    %4 = vector.load %arg4[%c0_4, %c0_5, %c0_6] : memref<1x16x64xf32, #tpu.memory_space<vmem>>, vector<1x16x32xf32>
    %5 = vector.shape_cast %4 : vector<1x16x32xf32> to vector<16x32xf32>
    %6 = vector.shape_cast %3 : vector<16x32xf32> to vector<1x16x32xf32>
    tpu.vector_store %arg4[%c0_4, %c0_5, %c0_6], %6 {strides = array<i32>} : memref<1x16x64xf32, #tpu.memory_space<vmem>>, vector<1x16x32xf32>,
    %c0_7 = arith.constant 0 : index
    %c0_8 = arith.constant 0 : index
    %c32 = arith.constant 32 : index
    %7 = vector.load %arg4[%c0_7, %c0_8, %c32] : memref<1x16x64xf32, #tpu.memory_space<vmem>>, vector<1x16x32xf32>
    %8 = vector.shape_cast %7 : vector<1x16x32xf32> to vector<16x32xf32>
    %9 = vector.shape_cast %3 : vector<16x32xf32> to vector<1x16x32xf32>
    tpu.vector_store %arg4[%c0_7, %c0_8, %c32], %9 {strides = array<i32>} : memref<1x16x64xf32, #tpu.memory_space<vmem>>, vector<1x16x32xf32>,
    return
  }
  func.func @transform_0(%arg0: i32, %arg1: i32) -> (i32, i32, i32) {
    %c0_i32 = arith.constant 0 : i32
    %c0_i32_0 = arith.constant 0 : i32
    return %arg0, %arg1, %c0_i32 : i32, i32, i32
  }
  func.func @transform_1(%arg0: i32, %arg1: i32) -> (i32, i32) {
    %c0_i32 = arith.constant 0 : i32
    %c0_i32_0 = arith.constant 0 : i32
    %c0_i32_1 = arith.constant 0 : i32
    return %c0_i32, %c0_i32_0 : i32, i32
  }
  func.func @transform_2(%arg0: i32, %arg1: i32) -> (i32, i32, i32) {
    %c0_i32 = arith.constant 0 : i32
    %c0_i32_0 = arith.constant 0 : i32
    return %arg0, %arg1, %c0_i32 : i32, i32, i32
  }
}

</mosaic_0001>

<bundles_post_ra>
// kernel: upsample2_nearest.1
= control target key start
LH: loop header
LB: loop body
LE: loop exit
PB: predicated region body
PF: predicated region fallthrough
CT: control target
= control target key end

     0   :  { %7 = vsyncpa [#allocation3], 0  ;;  %s708_s0 = inlined_call_operand.hbm [shape: f32[8,16,16], index: 0, kind: input, shape index: {}]   ;;  %s709_s1 = inlined_call_operand.vmem [shape: f32[16,32], index: 1, kind: input, shape index: {}]   ;;  %s710_s2 = inlined_call_operand.vmem [shape: f32[8,16,64], index: 2, kind: output, shape index: {}]  }
   0x1   :  { %9 = vsyncpa [#allocation3 + $0x1], 0  ;;  %s578_s9 = smov 0   ;;  %s580_s10 = smov 0  }
   0x2   :  { %s582_s11 = smov 0   ;;  %s584_s12 = smov 0  }
   0x3   :  { %s586_s13 = smov 0   ;;  %s588_s14 = smov 0  }
   0x4 LB: > { %s387_s15 = sadd.s32 4294967295, %s557_s14   ;;  %s27_s16 = sadd.s32 1, %s553_s13  ;;  %s557_s14 = sphi %s588_s14, %s15_s14   ;;  %s553_s13 = sphi %s586_s13, %s718_s13   ;;  %s549_s12 = sphi %s584_s12, %s717_s12   ;;  %s545_s11 = sphi %s582_s11, %s716_s11   ;;  %s541_s10 = sphi %s580_s10, %s715_s10   ;;  %s537_s9 = sphi %s578_s9, %s714_s9  }
   0x5   : > { %p29_p0 = scmp.ge.s32.totalorder %s27_s16, 8  ;;  %s36_s17 = sadd.s32 1, %s545_s11 }
   0x6   : > { %p43_p1 = scmp.ne.s32.totalorder %s545_s11, %s541_s10  ;;  %p44_p2 = scmp.eq.s32.totalorder %s557_s14, 0 }
   0x7   : > { %s720_s16 = smov (%p29_p0, %s27_s16), 0  ;;  %p49_p4 = scmp.ne.s32.totalorder %s541_s10, %s537_s9 }
   0x8   : > { %p614_p3 = por %p44_p2, %p43_p1  ;;  %s31_s19 = ssub.s32 %s553_s13, %s720_s16 }
   0x9   : > { %p50_p5 = scmp.eq.s32.totalorder %s387_s15, 0  ;;  %p34_p6 = scmp.eq.s32.totalorder %s31_s19, 0 }
   0xa   : > { %p425_p8 = scmp.lt.s32.totalorder %s557_s14, 8  ;;  %s125_s22 = sand.u32 1, %s545_s11  }
   0xb   : > { %p621_p7 = por %p50_p5, %p49_p4  ;;  %s402_s23 = sshll.u32 %s553_s13, 8 }
   0xc   : > { %s627_s21 = scalar_select %p34_p6, %s545_s11, %s36_s17  }
   0xd   : > { %s391_s24 = sshll.u32 %s125_s22, 4  ;;  %s634_s27 = scalar_lea.hbm %s708_s0, %s402_s23 }
   0xe   : > { %s129_s28 = scalar_lea.vmem [#allocation2], %s391_s24  ;;  %p638_p9 = pnand %p425_p8, %p614_p3 }
   0xf   : > { %s138_s29 = sshll.u32 %s129_s28, 4  ;;  %s644_s3 = scalar_lea.sflag [#allocation3], %s125_s22  ;;  %s642_s29 = int_to_ptr.vmem [resolvable:$true] %s138_s29 }
  0x10   : > { %s477_s4 = scalar_lea.hbm %s634_s27, 256  ;;  %p479_p11 = pneg %p638_p9 }
  0x11   : > { %p478_p10 = scmp.ne.s32.totalorder %s634_s27, %s477_s4  ;;  %s482_s7 = scalar_lea.hbm %s708_s0, 2048 }
  0x12   : > { %p483_p0 = scmp.lt.u32.totalorder %s634_s27, %s708_s0  ;;  %p484_p1 = scmp.lt.u32.totalorder %s482_s7, %s477_s4 }
  0x13   : > { %p480_p12 = pnand %p479_p11, %p478_p10  ;;  %p486_p3 = scmp.lt.u32.totalorder %s477_s4, %s634_s27 }
  0x14   : > { %p485_p2 = por %p484_p1, %p483_p0 }
  0x15   : > { %p481_p13 = pneg %p480_p12 }
  0x16   : > { %p487_p4 = por %p486_p3, %p485_p2 }
  0x18   : > { %p488_p5 = pnand %p487_p4, %p481_p13 }
  0x1a   : > { %491 = shalt.err (!%p488_p5)
}
  0x1b   : > { %s492_s15 = scalar_lea.vmem %s642_s29, 256  ;;  %s559_s17 = smov [#allocation2]  }
  0x1c   : > { %p493_p6 = scmp.ne.s32.totalorder %s642_s29, %s492_s15  ;;  %s497_s18 = sshll.u32 %s559_s17, 4  ;;  %s498_s18 = int_to_ptr.vmem [resolvable:$false] %s497_s18 }
  0x1d   : > { %s499_s19 = scalar_lea.vmem %s498_s18, 512  ;;  %p500_p12 = scmp.lt.s32.totalorder %s642_s29, %s498_s18 }
  0x1e   : > { %p495_p8 = pnand %p493_p6, %p479_p11  ;;  %p501_p0 = scmp.lt.s32.totalorder %s499_s19, %s492_s15 }
  0x20   : > { %p496_p10 = pneg %p495_p8  ;;  %p502_p1 = por %p501_p0, %p500_p12 }
  0x22   : > { %p503_p2 = pnand %p502_p1, %p496_p10 }
  0x24   : > { %506 = shalt.err (!%p503_p2)
}
  0x25   : > { %s560_s22 = smov 128   ;;  %s561_s23 = smov 8  }
  0x26   : > { %424 = dma.hbm_to_vmem [thread:$0]  (!%p638_p9), %s634_s27, 256, %s642_s29, %s644_s3, %s560_s22, %s560_s22, %s561_s23  }
  0x27   : > { %p394_p11 = scmp.ge.s32.totalorder %s557_s14, 1  ;;  %p146_p13 = scmp.lt.s32.totalorder %s557_s14, 9 }
  0x29   : > { %p147_p3 = pnand %p394_p11, %p146_p13 }
  0x2a   : > { %s152_s24 = sand.u32 (!%p147_p3), 1, %s541_s10  }
  0x2b   : > { %150 = sbr.rel (%p147_p3) target bundleno = 391 (0x187), region = 28  ;;  %s395_s25 = sshll.u32 (!%p147_p3), %s152_s24, 4 }
  0x2c   : > { %s153_s26 = scalar_lea.sflag (!%p147_p3), [#allocation3], %s152_s24  ;;  %s156_s28 = scalar_lea.vmem (!%p147_p3), [#allocation2], %s395_s25 }
  0x32   : > { %532 = dma.done.wait (%p621_p7), %s153_s26, 256  }
  0x33   : > { %534 = vsyncadd (%p621_p7), %s153_s26, 4294967040  ;;  %vm196_vm0 = vcmask 130048   ;;  %v194_v0 = vld [vmem:[%s709_s1] sm:$0xff]  ;;  %v195_v1 = vld [vmem:[%s709_s1 + $0x8] sm:$0xff]  ;;  %p183_p9 = scmp.lt.s32.totalorder %s549_s12, 7  ;;  %vm278_vm1 = vcmask 261120  }
  0x34   : > { %v192_v2 = vld [vmem:[%s156_s28] sm:$0xff]  ;;  %v415_v3 = vpack.c.bf16 %v195_v1, %v194_v0  ;;  %v193_v4 = vld [vmem:[%s156_s28 + $0x8] sm:$0xff]  ;;  %s562_s7 = smov 32   ;;  %vm289_vm2 = vcmask 523520  }
  0x35   : > { %412 = vmatprep.mubr.msk.f32.mxu0 %vm196_vm0, %v192_v2  ;;  %s722_s12 = smov (!%p183_p9, %s549_s12), 7 }
  0x36   : > { %416 = vmatprep.subr.bf16.mxu0 %v415_v3  ;;  %s403_s20 = sshll.u32 %s722_s12, 4 }
  0x37   : > { %418 = vmatpush3.bf16.msra.mxu0 %v415_v3  ;;  %s190_s6 = scalar_lea.vmem %s710_s2, %s403_s20 }
  0x3a   : > { %413 = vmatmul.mubr.msk.f32.vlgmr.msra.gmra.mrb[0].mxu0 %vm196_vm0, %v193_v4 }
 0x10d   : > { %v414_v5 = vpop.f32.mrb[0].mxu0 }
 0x10e   : > { %280 = vst.msk [vmem:[%s190_s6 + $0x8] sm:$0xff] %vm278_vm1, %v414_v5  ;;  %v269_v6 = vpop.f32.mrb[1].mxu0 }
 0x10f   : > { %279 = vst.msk [vmem:[%s190_s6] sm:$0xff] %vm278_vm1, %v269_v6  ;;  %283 = vrot.lane.b32.xlu0 %v269_v6, %s562_s7 }
 0x113   : > { %285 = vrot.lane.b32.xlu0 %v414_v5, %s562_s7 }
 0x181   : > { %v284_v7 = vpop.permute.xlu0 %283 }
 0x182   : > { %290 = vst.msk [vmem:[%s190_s6] sm:$0xff] %vm289_vm2, %v284_v7 }
 0x185   : > { %v286_v8 = vpop.permute.xlu0 %285 }
 0x186   : > { %291 = vst.msk [vmem:[%s190_s6 + $0x8] sm:$0xff] %vm289_vm2, %v286_v8 }
 0x187 PF: > { %s15_s14 = sadd.s32 1, %s557_s14   ;;  %s714_s9 = smov %s541_s10 }
 0x188   : > { %p12_p7 = scmp.ge.s32.totalorder %s15_s14, 10   ;;  %s715_s10 = smov %s545_s11 }
 0x189   : > { %s716_s11 = smov %s627_s21  ;;  %s717_s12 = smov %s553_s13 }
 0x18a   : > { %s718_s13 = smov %s720_s16  ;;  %14 = sbr.rel (!%p12_p7) target bundleno = 4 (0x4), region = 68 }
 0x191   :  { %322 = vsyncpa [#allocation3], 1 }
 0x192   :  { %324 = vsyncpa [#allocation3 + $0x1], 1 }

</bundles_post_ra>
